<compile_context>
chip_gen: v5e
topology: v5e:2x2
jax: 0.10.0
libtpu: 0.0.40
codegen_flags: <defaults>
</compile_context>

<pallas_src>
import functools
import math

import jax
import jax.numpy as jnp
from jax.experimental import pallas as pl
from jax.experimental.pallas import tpu as pltpu


def _infonce_kernel(x1r_ref, x2r_ref, x1c_ref, x2c_ref, o_ref,
                    x1r_n, x2r_n, logpos_sc, acc_top, acc_bot,
                    *, inv_temp: float, batch: int):
    """One (row-tile, col-tile) step of the masked softmax-denominator sweep."""
    i = pl.program_id(0)
    j = pl.program_id(1)
    nj = pl.num_programs(1)

    tbr = x1r_ref.shape[0]
    tbc = x1c_ref.shape[0]

    eps_sq = jnp.float32(1e-24)                 # (F.normalize eps = 1e-12) ** 2
    scale = jnp.float32(math.sqrt(inv_temp))    # fold 1/T into both operands

    def norm_scale(ref):
        x = ref[...].astype(jnp.float32)
        ss = jnp.sum(x * x, axis=-1, keepdims=True)
        # x / max(||x||, eps) * sqrt(1/T): EUP rsqrt + VPU multiply (no divide).
        return x * (jax.lax.rsqrt(jnp.maximum(ss, eps_sq)) * scale)

    dn = (((1,), (1,)), ((), ()))   # contract the feature dim of both operands

    # Row-tile work is invariant in j: normalize once, stash bf16 copies for the
    # MXU, and precompute log(pos) lane-dense (1, tbr) via a ones-vector matmul.
    @pl.when(j == 0)
    def _():
        x1r_f = norm_scale(x1r_ref)             # (tbr, D) f32
        x2r_f = norm_scale(x2r_ref)
        x1r_n[...] = x1r_f.astype(jnp.bfloat16)
        x2r_n[...] = x2r_f.astype(jnp.bfloat16)
        ones = jnp.ones((1, x1r_f.shape[1]), jnp.float32)
        # log(pos_r) = sum_d x1[r,d]*x2[r,d] / T  (the 1/T scale is already folded in)
        logpos_sc[...] = jax.lax.dot_general(ones, x1r_f * x2r_f, dn,
                                             preferred_element_type=jnp.float32)
        acc_top[...] = jnp.zeros_like(acc_top)
        acc_bot[...] = jnp.zeros_like(acc_bot)

    x1c = norm_scale(x1c_ref).astype(jnp.bfloat16)   # (tbc, D)
    x2c = norm_scale(x2c_ref).astype(jnp.bfloat16)
    x1r = x1r_n[...]
    x2r = x2r_n[...]

    # (tbc, tbr) blocks of sim/T; lhs = column tile so the axis-0 reduction lands
    # lane-dense on the row-tile axis.  bf16 operands, f32 accumulation on the MXU.
    s_t1 = jax.lax.dot_general(x1c, x1r, dn, preferred_element_type=jnp.float32)
    s_t2 = jax.lax.dot_general(x2c, x1r, dn, preferred_element_type=jnp.float32)
    s_b1 = jax.lax.dot_general(x1c, x2r, dn, preferred_element_type=jnp.float32)
    s_b2 = jax.lax.dot_general(x2c, x2r, dn, preferred_element_type=jnp.float32)

    # Explicit mask: diagonal / correlated-pair entries (col_g == row_g in every
    # block) and padded columns (col_g >= batch) contribute nothing.
    row_g = i * tbr + jax.lax.broadcasted_iota(jnp.int32, (tbc, tbr), 1)
    col_g = j * tbc + jax.lax.broadcasted_iota(jnp.int32, (tbc, tbr), 0)
    mask = (col_g != row_g) & (col_g < batch)

    e_top = jnp.where(mask, jnp.exp(s_t1) + jnp.exp(s_t2), 0.0)
    e_bot = jnp.where(mask, jnp.exp(s_b1) + jnp.exp(s_b2), 0.0)
    acc_top[...] += jnp.sum(e_top, axis=0, keepdims=True)    # (1, tbr)
    acc_bot[...] += jnp.sum(e_bot, axis=0, keepdims=True)    # (1, tbr)

    @pl.when(j == nj - 1)
    def _():
        log_pos = logpos_sc[...]
        pos = jnp.exp(log_pos)
        # per-sample loss: mean over the two views of -log(pos / (pos + neg))
        loss = (0.5 * (jnp.log(pos + acc_top[...]) + jnp.log(pos + acc_bot[...]))
                - log_pos)
        o_ref[...] = loss.astype(o_ref.dtype)


def _vmem_capacity_bytes() -> int:
    try:
        return int(pltpu.get_tpu_info().vmem_capacity_bytes)
    except Exception:
        return 64 * 1024 * 1024     # assume the smallest (v7x per-TC) if unknown


def _plan(b: int, d: int):
    """Pick (tbr, tbc, b_pad, vmem_limit_bytes) — generation aware."""
    vmem_cap = _vmem_capacity_bytes()
    big_vmem = vmem_cap >= 100 * 1024 * 1024          # v5e/v6e: 128 MiB, v7x: 64 MiB
    vmem_limit = min(int(vmem_cap * 0.75), 96 * 1024 * 1024)

    if b <= 512:
        # One block each way; tiny problem, grid degenerates to (1, 1).
        return b, b, b, vmem_limit

    # Row tile = lane dim of the (1, B) output -> power-of-two multiple of 128.
    # v5e/v6e: up to 1024 (amortizes the per-step column re-stream); v7x: cap at
    # 512 and keep the row grid >= 2 so megacore can split the "parallel" axis.
    row_cap = 1024 if big_vmem else 512
    tbr = 128
    while tbr * 2 <= min(row_cap, b // 2):
        tbr *= 2

    # Column tile: power-of-two divisor of tbr; shrink it first when D is large so
    # the per-step footprint (4 f32 (tbc,tbr) temporaries, normalized col copies,
    # double-buffered input blocks) keeps comfortable VMEM headroom.
    tbc = min(512, tbr)
    budget = vmem_limit // 2
    while tbc > 64 and (4 * tbc * tbr + 6 * tbc * d + 4 * tbr * d) * 4 > budget:
        tbc //= 2

    b_pad = ((b + tbr - 1) // tbr) * tbr              # tbc | tbr | b_pad
    return tbr, tbc, b_pad, vmem_limit


def infonce_loss(out_1, out_2, temperature):
    """Pallas implementation of InfoNCE.forward. Returns per-sample loss [B]."""
    b, d = out_1.shape
    tbr, tbc, b_pad, vmem_limit = _plan(b, d)
    if b_pad != b:
        pad = ((0, b_pad - b), (0, 0))
        out_1 = jnp.pad(out_1, pad)
        out_2 = jnp.pad(out_2, pad)
    grid = (b_pad // tbr, b_pad // tbc)

    kernel = functools.partial(_infonce_kernel,
                               inv_temp=1.0 / float(temperature), batch=b)
    res = pl.pallas_call(
        kernel,
        out_shape=jax.ShapeDtypeStruct((1, b_pad), jnp.float32),
        grid_spec=pltpu.PrefetchScalarGridSpec(
            num_scalar_prefetch=0,
            grid=grid,
            in_specs=[
                pl.BlockSpec((tbr, d), lambda i, j: (i, 0)),   # out_1 row tile
                pl.BlockSpec((tbr, d), lambda i, j: (i, 0)),   # out_2 row tile
                pl.BlockSpec((tbc, d), lambda i, j: (j, 0)),   # out_1 col tile
                pl.BlockSpec((tbc, d), lambda i, j: (j, 0)),   # out_2 col tile
            ],
            out_specs=pl.BlockSpec((1, tbr), lambda i, j: (0, i)),
            scratch_shapes=[
                pltpu.VMEM((tbr, d), jnp.bfloat16),   # normalized row tile, view 1
                pltpu.VMEM((tbr, d), jnp.bfloat16),   # normalized row tile, view 2
                pltpu.VMEM((1, tbr), jnp.float32),    # log(pos) for this row tile
                pltpu.VMEM((1, tbr), jnp.float32),    # running neg sums, top rows
                pltpu.VMEM((1, tbr), jnp.float32),    # running neg sums, bottom rows
            ],
        ),
        compiler_params=pltpu.CompilerParams(
            dimension_semantics=("parallel", "arbitrary"),
            vmem_limit_bytes=vmem_limit,
        ),
    )(out_1, out_2, out_1, out_2)
    return res[0, :b]


def _infonce_ref(out_1, out_2, temperature):
    """Pure-JAX reference mirroring the PyTorch forward exactly."""
    eps = 1e-12
    b = out_1.shape[0]
    x1 = out_1 / jnp.maximum(jnp.linalg.norm(out_1, axis=1, keepdims=True), eps)
    x2 = out_2 / jnp.maximum(jnp.linalg.norm(out_2, axis=1, keepdims=True), eps)
    out = jnp.concatenate([x1, x2], axis=0)
    sim = jnp.exp(out @ out.T / temperature)
    n = 2 * b
    row = jnp.arange(n)[:, None]
    col = jnp.arange(n)[None, :]
    diff = jnp.abs(row - col)
    mask = (diff != 0) & (diff != b)
    neg = jnp.sum(jnp.where(mask, sim, 0.0), axis=1)
    pos = jnp.exp(jnp.sum(x1 * x2, axis=-1) / temperature)
    pos = jnp.concatenate([pos, pos], axis=0)
    logits = -jnp.log(pos / (pos + neg))
    return jnp.mean(logits.reshape(2, -1), axis=0)


if __name__ == "__main__":
    # Module "parameters": temperature (InfoNCE has no learned weights).
    temperature = 0.5

    batch, dim = 8, 32
    key = jax.random.PRNGKey(0)
    k1, k2 = jax.random.split(key)
    out_1 = jax.random.normal(k1, (batch, dim), dtype=jnp.float32)
    out_2 = jax.random.normal(k2, (batch, dim), dtype=jnp.float32)

    loss = infonce_loss(out_1, out_2, temperature)
    jax.block_until_ready(loss)

    ref = _infonce_ref(out_1, out_2, temperature)
    assert loss.shape == (batch,)
    # Tolerance accounts for bf16 MXU operands in the kernel (and default-precision
    # matmul in the reference); worst-case loss error is ~1e-2 at T=0.5.
    assert jnp.allclose(loss, ref, atol=3e-2, rtol=3e-2), (loss, ref)

    print("KERNEL_OK")
</pallas_src>

<mosaic_0001>
module attributes {stable_mosaic.version = 11 : i64} {
  func.func @_infonce_kernel(%arg0: i32, %arg1: i32, %arg2: memref<8x32xf32, #tpu.memory_space<vmem>>, %arg3: memref<8x32xf32, #tpu.memory_space<vmem>>, %arg4: memref<8x32xf32, #tpu.memory_space<vmem>>, %arg5: memref<8x32xf32, #tpu.memory_space<vmem>>, %arg6: memref<1x8xf32, #tpu.memory_space<vmem>>, %arg7: memref<8x32xbf16, #tpu.memory_space<vmem>>, %arg8: memref<8x32xbf16, #tpu.memory_space<vmem>>, %arg9: memref<1x8xf32, #tpu.memory_space<vmem>>, %arg10: memref<1x8xf32, #tpu.memory_space<vmem>>, %arg11: memref<1x8xf32, #tpu.memory_space<vmem>>) attributes {dimension_semantics = [#tpu.dimension_semantics<parallel>, #tpu.dimension_semantics<arbitrary>], iteration_bounds = array<i64: 1, 1>, scalar_prefetch = 0 : i64, scratch_operands = 5 : i64, tpu.core_type = #tpu.core_type<tc>, window_params = [{transform_indices = @transform_0, window_bounds = array<i64: 8, 32>}, {transform_indices = @transform_1, window_bounds = array<i64: 8, 32>}, {transform_indices = @transform_2, window_bounds = array<i64: 8, 32>}, {transform_indices = @transform_3, window_bounds = array<i64: 8, 32>}, {transform_indices = @transform_4, window_bounds = array<i64: 1, 8>}]} {
    %c0_i32 = arith.constant 0 : i32
    %0 = arith.cmpi eq, %arg1, %c0_i32 : i32
    %1 = arith.extui %0 : i1 to i32
    %cst = arith.constant 1.000000e-24 : f32
    %cst_0 = arith.constant 1.41421354 : f32
    %c0_i32_1 = arith.constant 0 : i32
    %2 = arith.cmpi ne, %1, %c0_i32_1 : i32
    scf.if %2 {
      %c0_35 = arith.constant 0 : index
      %c0_36 = arith.constant 0 : index
      %68 = vector.load %arg2[%c0_35, %c0_36] : memref<8x32xf32, #tpu.memory_space<vmem>>, vector<8x32xf32>
      %69 = arith.mulf %68, %68 : vector<8x32xf32>
      %cst_37 = arith.constant dense<0.000000e+00> : vector<8xf32>
      %70 = vector.multi_reduction <add>, %69, %cst_37 [1] : vector<8x32xf32> to vector<8xf32>
      %71 = vector.shape_cast %70 : vector<8xf32> to vector<8x1xf32>
      %72 = vector.broadcast %cst : f32 to vector<8x1xf32>
      %73 = arith.maximumf %71, %72 : vector<8x1xf32>
      %74 = math.rsqrt %73 : vector<8x1xf32>
      %75 = vector.broadcast %cst_0 : f32 to vector<8x1xf32>
      %76 = arith.mulf %74, %75 : vector<8x1xf32>
      %77 = vector.broadcast %76 : vector<8x1xf32> to vector<8x32xf32>
      %78 = arith.mulf %68, %77 : vector<8x32xf32>
      %c0_38 = arith.constant 0 : index
      %c0_39 = arith.constant 0 : index
      %79 = vector.load %arg3[%c0_38, %c0_39] : memref<8x32xf32, #tpu.memory_space<vmem>>, vector<8x32xf32>
      %80 = arith.mulf %79, %79 : vector<8x32xf32>
      %cst_40 = arith.constant dense<0.000000e+00> : vector<8xf32>
      %81 = vector.multi_reduction <add>, %80, %cst_40 [1] : vector<8x32xf32> to vector<8xf32>
      %82 = vector.shape_cast %81 : vector<8xf32> to vector<8x1xf32>
      %83 = vector.broadcast %cst : f32 to vector<8x1xf32>
      %84 = arith.maximumf %82, %83 : vector<8x1xf32>
      %85 = math.rsqrt %84 : vector<8x1xf32>
      %86 = vector.broadcast %cst_0 : f32 to vector<8x1xf32>
      %87 = arith.mulf %85, %86 : vector<8x1xf32>
      %88 = vector.broadcast %87 : vector<8x1xf32> to vector<8x32xf32>
      %89 = arith.mulf %79, %88 : vector<8x32xf32>
      %90 = arith.truncf %78 : vector<8x32xf32> to vector<8x32xbf16>
      %c0_41 = arith.constant 0 : index
      %c0_42 = arith.constant 0 : index
      %91 = vector.load %arg7[%c0_41, %c0_42] : memref<8x32xbf16, #tpu.memory_space<vmem>>, vector<8x32xbf16>
      tpu.vector_store %arg7[%c0_41, %c0_42], %90 {strides = array<i32>} : memref<8x32xbf16, #tpu.memory_space<vmem>>, vector<8x32xbf16>,
      %92 = arith.truncf %89 : vector<8x32xf32> to vector<8x32xbf16>
      %c0_43 = arith.constant 0 : index
      %c0_44 = arith.constant 0 : index
      %93 = vector.load %arg8[%c0_43, %c0_44] : memref<8x32xbf16, #tpu.memory_space<vmem>>, vector<8x32xbf16>
      tpu.vector_store %arg8[%c0_43, %c0_44], %92 {strides = array<i32>} : memref<8x32xbf16, #tpu.memory_space<vmem>>, vector<8x32xbf16>,
      %cst_45 = arith.constant 1.000000e+00 : f32
      %94 = vector.broadcast %cst_45 : f32 to vector<1x32xf32>
      %95 = arith.mulf %78, %89 : vector<8x32xf32>
      %cst_46 = arith.constant dense<0.000000e+00> : vector<1x8xf32>
      %96 = tpu.matmul %94, %95, %cst_46 {dimension_numbers = #tpu.dot_dimension_numbers<[1], [1], [0], [0], [0, 0, 1, 0], [], []>} : vector<1x32xf32>, vector<8x32xf32>, vector<1x8xf32> -> vector<1x8xf32>
      %c0_47 = arith.constant 0 : index
      %c0_48 = arith.constant 0 : index
      %97 = vector.load %arg9[%c0_47, %c0_48] : memref<1x8xf32, #tpu.memory_space<vmem>>, vector<1x8xf32>
      tpu.vector_store %arg9[%c0_47, %c0_48], %96 {strides = array<i32>} : memref<1x8xf32, #tpu.memory_space<vmem>>, vector<1x8xf32>,
      %cst_49 = arith.constant 0.000000e+00 : f32
      %98 = vector.broadcast %cst_49 : f32 to vector<1x8xf32>
      %c0_50 = arith.constant 0 : index
      %c0_51 = arith.constant 0 : index
      %99 = vector.load %arg10[%c0_50, %c0_51] : memref<1x8xf32, #tpu.memory_space<vmem>>, vector<1x8xf32>
      tpu.vector_store %arg10[%c0_50, %c0_51], %98 {strides = array<i32>} : memref<1x8xf32, #tpu.memory_space<vmem>>, vector<1x8xf32>,
      %cst_52 = arith.constant 0.000000e+00 : f32
      %100 = vector.broadcast %cst_52 : f32 to vector<1x8xf32>
      %c0_53 = arith.constant 0 : index
      %c0_54 = arith.constant 0 : index
      %101 = vector.load %arg11[%c0_53, %c0_54] : memref<1x8xf32, #tpu.memory_space<vmem>>, vector<1x8xf32>
      tpu.vector_store %arg11[%c0_53, %c0_54], %100 {strides = array<i32>} : memref<1x8xf32, #tpu.memory_space<vmem>>, vector<1x8xf32>,
    } else {
    }
    %c0 = arith.constant 0 : index
    %c0_2 = arith.constant 0 : index
    %3 = vector.load %arg4[%c0, %c0_2] : memref<8x32xf32, #tpu.memory_space<vmem>>, vector<8x32xf32>
    %4 = arith.mulf %3, %3 : vector<8x32xf32>
    %cst_3 = arith.constant dense<0.000000e+00> : vector<8xf32>
    %5 = vector.multi_reduction <add>, %4, %cst_3 [1] : vector<8x32xf32> to vector<8xf32>
    %6 = vector.shape_cast %5 : vector<8xf32> to vector<8x1xf32>
    %cst_4 = arith.constant 1.000000e-24 : f32
    %7 = vector.broadcast %cst_4 : f32 to vector<8x1xf32>
    %8 = arith.maximumf %6, %7 : vector<8x1xf32>
    %9 = math.rsqrt %8 : vector<8x1xf32>
    %cst_5 = arith.constant 1.41421354 : f32
    %10 = vector.broadcast %cst_5 : f32 to vector<8x1xf32>
    %11 = arith.mulf %9, %10 : vector<8x1xf32>
    %12 = vector.broadcast %11 : vector<8x1xf32> to vector<8x32xf32>
    %13 = arith.mulf %3, %12 : vector<8x32xf32>
    %14 = arith.truncf %13 : vector<8x32xf32> to vector<8x32xbf16>
    %c0_6 = arith.constant 0 : index
    %c0_7 = arith.constant 0 : index
    %15 = vector.load %arg5[%c0_6, %c0_7] : memref<8x32xf32, #tpu.memory_space<vmem>>, vector<8x32xf32>
    %16 = arith.mulf %15, %15 : vector<8x32xf32>
    %cst_8 = arith.constant dense<0.000000e+00> : vector<8xf32>
    %17 = vector.multi_reduction <add>, %16, %cst_8 [1] : vector<8x32xf32> to vector<8xf32>
    %18 = vector.shape_cast %17 : vector<8xf32> to vector<8x1xf32>
    %cst_9 = arith.constant 1.000000e-24 : f32
    %19 = vector.broadcast %cst_9 : f32 to vector<8x1xf32>
    %20 = arith.maximumf %18, %19 : vector<8x1xf32>
    %21 = math.rsqrt %20 : vector<8x1xf32>
    %cst_10 = arith.constant 1.41421354 : f32
    %22 = vector.broadcast %cst_10 : f32 to vector<8x1xf32>
    %23 = arith.mulf %21, %22 : vector<8x1xf32>
    %24 = vector.broadcast %23 : vector<8x1xf32> to vector<8x32xf32>
    %25 = arith.mulf %15, %24 : vector<8x32xf32>
    %26 = arith.truncf %25 : vector<8x32xf32> to vector<8x32xbf16>
    %c0_11 = arith.constant 0 : index
    %c0_12 = arith.constant 0 : index
    %27 = vector.load %arg7[%c0_11, %c0_12] : memref<8x32xbf16, #tpu.memory_space<vmem>>, vector<8x32xbf16>
    %c0_13 = arith.constant 0 : index
    %c0_14 = arith.constant 0 : index
    %28 = vector.load %arg8[%c0_13, %c0_14] : memref<8x32xbf16, #tpu.memory_space<vmem>>, vector<8x32xbf16>
    %cst_15 = arith.constant dense<0.000000e+00> : vector<8x8xf32>
    %29 = tpu.matmul %14, %27, %cst_15 {dimension_numbers = #tpu.dot_dimension_numbers<[1], [1], [0], [0], [0, 0, 1, 0], [], []>} : vector<8x32xbf16>, vector<8x32xbf16>, vector<8x8xf32> -> vector<8x8xf32>
    %cst_16 = arith.constant dense<0.000000e+00> : vector<8x8xf32>
    %30 = tpu.matmul %26, %27, %cst_16 {dimension_numbers = #tpu.dot_dimension_numbers<[1], [1], [0], [0], [0, 0, 1, 0], [], []>} : vector<8x32xbf16>, vector<8x32xbf16>, vector<8x8xf32> -> vector<8x8xf32>
    %cst_17 = arith.constant dense<0.000000e+00> : vector<8x8xf32>
    %31 = tpu.matmul %14, %28, %cst_17 {dimension_numbers = #tpu.dot_dimension_numbers<[1], [1], [0], [0], [0, 0, 1, 0], [], []>} : vector<8x32xbf16>, vector<8x32xbf16>, vector<8x8xf32> -> vector<8x8xf32>
    %cst_18 = arith.constant dense<0.000000e+00> : vector<8x8xf32>
    %32 = tpu.matmul %26, %28, %cst_18 {dimension_numbers = #tpu.dot_dimension_numbers<[1], [1], [0], [0], [0, 0, 1, 0], [], []>} : vector<8x32xbf16>, vector<8x32xbf16>, vector<8x8xf32> -> vector<8x8xf32>
    %c8_i32 = arith.constant 8 : i32
    %33 = arith.muli %arg0, %c8_i32 : i32
    %34 = tpu.iota {dimensions = array<i32: 1>} : vector<8x8xi32>
    %35 = vector.broadcast %33 : i32 to vector<8x8xi32>
    %36 = arith.addi %35, %34 : vector<8x8xi32>
    %c8_i32_19 = arith.constant 8 : i32
    %37 = arith.muli %arg1, %c8_i32_19 : i32
    %38 = tpu.iota {dimensions = array<i32: 0>} : vector<8x8xi32>
    %39 = vector.broadcast %37 : i32 to vector<8x8xi32>
    %40 = arith.addi %39, %38 : vector<8x8xi32>
    %41 = arith.cmpi ne, %40, %36 : vector<8x8xi32>
    %c8_i32_20 = arith.constant 8 : i32
    %42 = vector.broadcast %c8_i32_20 : i32 to vector<8x8xi32>
    %43 = arith.cmpi slt, %40, %42 : vector<8x8xi32>
    %44 = arith.andi %41, %43 : vector<8x8xi1>
    %45 = math.exp %29 : vector<8x8xf32>
    %46 = math.exp %30 : vector<8x8xf32>
    %47 = arith.addf %45, %46 : vector<8x8xf32>
    %cst_21 = arith.constant 0.000000e+00 : f32
    %48 = vector.broadcast %cst_21 : f32 to vector<8x8xf32>
    %49 = arith.select %44, %47, %48 : vector<8x8xi1>, vector<8x8xf32>
    %50 = math.exp %31 : vector<8x8xf32>
    %51 = math.exp %32 : vector<8x8xf32>
    %52 = arith.addf %50, %51 : vector<8x8xf32>
    %cst_22 = arith.constant 0.000000e+00 : f32
    %53 = vector.broadcast %cst_22 : f32 to vector<8x8xf32>
    %54 = arith.select %44, %52, %53 : vector<8x8xi1>, vector<8x8xf32>
    %c0_23 = arith.constant 0 : index
    %c0_24 = arith.constant 0 : index
    %55 = vector.load %arg10[%c0_23, %c0_24] : memref<1x8xf32, #tpu.memory_space<vmem>>, vector<1x8xf32>
    %cst_25 = arith.constant dense<0.000000e+00> : vector<8xf32>
    %56 = vector.multi_reduction <add>, %49, %cst_25 [0] : vector<8x8xf32> to vector<8xf32>
    %57 = vector.shape_cast %56 : vector<8xf32> to vector<1x8xf32>
    %58 = arith.addf %55, %57 : vector<1x8xf32>
    %c0_26 = arith.constant 0 : index
    %c0_27 = arith.constant 0 : index
    %59 = vector.load %arg10[%c0_26, %c0_27] : memref<1x8xf32, #tpu.memory_space<vmem>>, vector<1x8xf32>
    tpu.vector_store %arg10[%c0_26, %c0_27], %58 {strides = array<i32>} : memref<1x8xf32, #tpu.memory_space<vmem>>, vector<1x8xf32>,
    %c0_28 = arith.constant 0 : index
    %c0_29 = arith.constant 0 : index
    %60 = vector.load %arg11[%c0_28, %c0_29] : memref<1x8xf32, #tpu.memory_space<vmem>>, vector<1x8xf32>
    %cst_30 = arith.constant dense<0.000000e+00> : vector<8xf32>
    %61 = vector.multi_reduction <add>, %54, %cst_30 [0] : vector<8x8xf32> to vector<8xf32>
    %62 = vector.shape_cast %61 : vector<8xf32> to vector<1x8xf32>
    %63 = arith.addf %60, %62 : vector<1x8xf32>
    %c0_31 = arith.constant 0 : index
    %c0_32 = arith.constant 0 : index
    %64 = vector.load %arg11[%c0_31, %c0_32] : memref<1x8xf32, #tpu.memory_space<vmem>>, vector<1x8xf32>
    tpu.vector_store %arg11[%c0_31, %c0_32], %63 {strides = array<i32>} : memref<1x8xf32, #tpu.memory_space<vmem>>, vector<1x8xf32>,
    %c0_i32_33 = arith.constant 0 : i32
    %65 = arith.cmpi eq, %arg1, %c0_i32_33 : i32
    %66 = arith.extui %65 : i1 to i32
    %c0_i32_34 = arith.constant 0 : i32
    %67 = arith.cmpi ne, %66, %c0_i32_34 : i32
    scf.if %67 {
      %c0_35 = arith.constant 0 : index
      %c0_36 = arith.constant 0 : index
      %68 = vector.load %arg9[%c0_35, %c0_36] : memref<1x8xf32, #tpu.memory_space<vmem>>, vector<1x8xf32>
      %69 = math.exp %68 : vector<1x8xf32>
      %c0_37 = arith.constant 0 : index
      %c0_38 = arith.constant 0 : index
      %70 = vector.load %arg10[%c0_37, %c0_38] : memref<1x8xf32, #tpu.memory_space<vmem>>, vector<1x8xf32>
      %71 = arith.addf %69, %70 : vector<1x8xf32>
      %72 = math.log %71 : vector<1x8xf32>
      %c0_39 = arith.constant 0 : index
      %c0_40 = arith.constant 0 : index
      %73 = vector.load %arg11[%c0_39, %c0_40] : memref<1x8xf32, #tpu.memory_space<vmem>>, vector<1x8xf32>
      %74 = arith.addf %69, %73 : vector<1x8xf32>
      %75 = math.log %74 : vector<1x8xf32>
      %76 = arith.addf %72, %75 : vector<1x8xf32>
      %cst_41 = arith.constant 5.000000e-01 : f32
      %77 = vector.broadcast %cst_41 : f32 to vector<1x8xf32>
      %78 = arith.mulf %77, %76 : vector<1x8xf32>
      %79 = arith.subf %78, %68 : vector<1x8xf32>
      %c0_42 = arith.constant 0 : index
      %c0_43 = arith.constant 0 : index
      %80 = vector.load %arg6[%c0_42, %c0_43] : memref<1x8xf32, #tpu.memory_space<vmem>>, vector<1x8xf32>
      tpu.vector_store %arg6[%c0_42, %c0_43], %79 {strides = array<i32>} : memref<1x8xf32, #tpu.memory_space<vmem>>, vector<1x8xf32>,
    } else {
    }
    return
  }
  func.func @transform_0(%arg0: i32, %arg1: i32) -> (i32, i32) {
    %c0_i32 = arith.constant 0 : i32
    %c0_i32_0 = arith.constant 0 : i32
    return %arg0, %c0_i32 : i32, i32
  }
  func.func @transform_1(%arg0: i32, %arg1: i32) -> (i32, i32) {
    %c0_i32 = arith.constant 0 : i32
    %c0_i32_0 = arith.constant 0 : i32
    return %arg0, %c0_i32 : i32, i32
  }
  func.func @transform_2(%arg0: i32, %arg1: i32) -> (i32, i32) {
    %c0_i32 = arith.constant 0 : i32
    %c0_i32_0 = arith.constant 0 : i32
    return %arg1, %c0_i32 : i32, i32
  }
  func.func @transform_3(%arg0: i32, %arg1: i32) -> (i32, i32) {
    %c0_i32 = arith.constant 0 : i32
    %c0_i32_0 = arith.constant 0 : i32
    return %arg1, %c0_i32 : i32, i32
  }
  func.func @transform_4(%arg0: i32, %arg1: i32) -> (i32, i32) {
    %c0_i32 = arith.constant 0 : i32
    %c0_i32_0 = arith.constant 0 : i32
    return %c0_i32, %arg0 : i32, i32
  }
}

</mosaic_0001>

<bundles_post_ra>
// kernel: tpu_custom_call.1
= control target key start
LH: loop header
LB: loop body
LE: loop exit
PB: predicated region body
PF: predicated region fallthrough
CT: control target
= control target key end

     0   :  { %9 = vsyncpa [#allocation8], 0  ;;  %s593_s0 = inlined_call_operand.hbm [shape: f32[8,32], index: 0, kind: input, shape index: {}]   ;;  %s594_s1 = inlined_call_operand.hbm [shape: f32[8,32], index: 1, kind: input, shape index: {}]   ;;  %s595_s2 = inlined_call_operand.hbm [shape: f32[8,32], index: 2, kind: input, shape index: {}]   ;;  %s596_s3 = inlined_call_operand.hbm [shape: f32[8,32], index: 3, kind: input, shape index: {}]   ;;  %s597_s4 = inlined_call_operand.hbm [shape: f32[1,8], index: 4, kind: output, shape index: {}]  }
   0x1   :  { %10 = vsyncpa [#allocation11], 0 }
   0x2   :  { %11 = vsyncpa [#allocation14], 0  ;;  %s29_s17 = sshll.u32 %s594_s1, 4  ;;  %s30_s17 = int_to_ptr.hbm [resolvable:$true] %s29_s17 }
   0x3   :  { %12 = vsyncpa [#allocation9], 0  ;;  %s503_s18 = smov [#allocation10]   ;;  %s18_s22 = sshll.u32 %s593_s0, 4  ;;  %s19_s22 = int_to_ptr.hbm [resolvable:$true] %s18_s22 }
   0x4   :  { %s31_s19 = sshll.u32 %s503_s18, 4  ;;  %s504_s23 = smov [#allocation7]   ;;  %s32_s19 = int_to_ptr.vmem [resolvable:$true] %s31_s19 }
   0x5   :  { %34 = dma.hbm_to_vmem [thread:$0]  %s30_s17, 128, %s32_s19, [#allocation11]  }
   0x6   :  { %s20_s24 = sshll.u32 %s504_s23, 4  ;;  %s40_s27 = sshll.u32 %s595_s2, 4  ;;  %s21_s24 = int_to_ptr.vmem [resolvable:$true] %s20_s24  ;;  %s41_s27 = int_to_ptr.hbm [resolvable:$true] %s40_s27 }
   0x7   :  { %23 = dma.hbm_to_vmem [thread:$0]  %s19_s22, 128, %s21_s24, [#allocation8]  }
   0x8   :  { %s51_s29 = sshll.u32 %s596_s3, 4  ;;  %s505_s30 = smov [#allocation12]   ;;  %s52_s29 = int_to_ptr.hbm [resolvable:$true] %s51_s29 }
   0x9   :  { %s42_s5 = sshll.u32 %s505_s30, 4  ;;  %s506_s0 = smov [#allocation13]   ;;  %s43_s5 = int_to_ptr.vmem [resolvable:$true] %s42_s5 }
   0xa   :  { %45 = dma.hbm_to_vmem [thread:$0]  %s41_s27, 128, %s43_s5, [#allocation11]  }
   0xb   :  { %s53_s6 = sshll.u32 %s506_s0, 4  ;;  %s54_s6 = int_to_ptr.vmem [resolvable:$true] %s53_s6 }
   0xc   :  { %56 = dma.hbm_to_vmem [thread:$0]  %s52_s29, 128, %s54_s6, [#allocation14]  }
   0xd   :  { %495 = dma.done.wait [#allocation8], 128  }
   0xe   :  { %496 = vsyncadd [#allocation8], 4294967168 }
   0xf   :  { %497 = dma.done.wait [#allocation11], 256  }
  0x10   :  { %498 = vsyncadd [#allocation11], 4294967040 }
  0x11   :  { %499 = dma.done.wait [#allocation14], 128  }
  0x12   :  { %500 = vsyncadd [#allocation14], 4294967168  ;;  %v78_v0 = vld [vmem:[#allocation7] sm:$0xff]  ;;  %vm80_vm0 = vcmask 261120   ;;  %v547_v1 = vld [vmem:[#allocation12] sm:$0xff]  ;;  %vm116_vm9 = vcmask 257024  }
  0x13   :  { %v79_v2 = vmul.f32 %v78_v0, %v78_v0  ;;  %v152_v3 = vmul.f32 %v547_v1, %v547_v1  ;;  %v551_v4 = vld [vmem:[#allocation10] sm:$0xff]  ;;  %v553_v5 = vld [vmem:[#allocation13] sm:$0xff]  ;;  %v507_v62 = vmov 1.0   ;;  %vm147_vm14 = vcmask 57344   ;;  %s509_s2 = smov [#allocation15]   ;;  %s328_s9 = sshll.u32 %s597_s4, 4  ;;  %s329_s9 = int_to_ptr.hbm [resolvable:$true] %s328_s9 }
  0x14   :  { %v98_v8 = vmul.f32 %v551_v4, %v551_v4  ;;  %v172_v9 = vmul.f32 %v553_v5, %v553_v5  ;;  %s326_s3 = sshll.u32 %s509_s2, 4  ;;  %s327_s3 = int_to_ptr.vmem [resolvable:$true] %s326_s3 }
  0x15   :  { %v81_v6 = vsel %vm80_vm0, %v79_v2, 0.0  ;;  %v154_v7 = vsel %vm80_vm0, %v152_v3, 0.0 }
  0x16   :  { %82 = vadd.xlane.f32.xlu0 %v81_v6  ;;  %155 = vadd.xlane.f32.xlu1 %v154_v7  ;;  %v99_v10 = vsel %vm80_vm0, %v98_v8, 0.0  ;;  %v173_v11 = vsel %vm80_vm0, %v172_v9, 0.0  ;;  %v257_v8 = vlaneseq }
  0x1e   :  { %100 = vadd.xlane.f32.xlu0 %v99_v10  ;;  %174 = vadd.xlane.f32.xlu1 %v173_v11 }
  0x89   :  { %v83_v12 = vpop.xlane.xlu0 %82  ;;  %v156_v13 = vpop.xlane.xlu1 %155 }
  0x8a   :  { %v84_v14 = vmax.f32 %v83_v12, 1e-24  ;;  %v157_v15 = vmax.f32 %v156_v13, 1e-24  ;;  %v258_v12 = vand.u32 127, %v257_v8  ;;  %v263_v13 = vshrl.u32 %v257_v8, 7 }
  0x8c   :  { %353 = vrsqrt.f32 %v84_v14  ;;  %vm91_vm2 = vweird.f32 %v84_v14  ;;  %vm164_vm4 = vweird.f32 %v157_v15  ;;  %vm266_vm15 = vcmp.ne.s32.totalorder %v263_v13, %v258_v12 }
  0x8d   :  { %355 = vrsqrt.f32 %v157_v15 }
  0x91   :  { %v101_v16 = vpop.xlane.xlu0 %100  ;;  %v175_v17 = vpop.xlane.xlu1 %174 }
  0x92   :  { %v354_v18 = vpop.eup %353  ;;  %v102_v19 = vmax.f32 %v101_v16, 1e-24  ;;  %v176_v20 = vmax.f32 %v175_v17, 1e-24 }
  0x93   :  { %v356_v21 = vpop.eup %355  ;;  %v86_v22 = vmul.f32 %v354_v18, %v84_v14  ;;  %vm92_vm1 = vweird.f32 %v354_v18 }
  0x94   :  { %v159_v23 = vmul.f32 %v356_v21, %v157_v15  ;;  %357 = vrsqrt.f32 %v102_v19  ;;  %vm93_vm3 = vmor %vm91_vm2, %vm92_vm1  ;;  %vm165_vm5 = vweird.f32 %v356_v21  ;;  %vm183_vm7 = vweird.f32 %v176_v20 }
  0x95   :  { %v87_v24 = vmul.f32 %v354_v18, %v86_v22  ;;  %359 = vrsqrt.f32 %v176_v20  ;;  %vm563_vm10 = vmor %vm164_vm4, %vm165_vm5  ;;  %vm109_vm11 = vweird.f32 %v102_v19 }
  0x96   :  { %v160_v26 = vmul.f32 %v356_v21, %v159_v23 }
  0x97   :  { %v88_v25 = vmul.f32 0.5, %v87_v24 }
  0x98   :  { %v161_v31 = vmul.f32 0.5, %v160_v26 }
  0x99   :  { %v89_v27 = vsub.f32 1.5, %v88_v25 }
  0x9a   :  { %v358_v28 = vpop.eup %357  ;;  %v162_v38 = vsub.f32 1.5, %v161_v31 }
  0x9b   :  { %v360_v29 = vpop.eup %359  ;;  %v90_v30 = vmul.f32 %v354_v18, %v89_v27  ;;  %v104_v32 = vmul.f32 %v358_v28, %v102_v19  ;;  %vm110_vm6 = vweird.f32 %v358_v28 }
  0x9c   :  { %v178_v33 = vmul.f32 %v360_v29, %v176_v20  ;;  %vm184_vm8 = vweird.f32 %v360_v29  ;;  %v163_v46 = vmul.f32 %v356_v21, %v162_v38  ;;  %vm111_vm12 = vmor %vm109_vm11, %vm110_vm6 }
  0x9d   :  { %v105_v34 = vmul.f32 %v358_v28, %v104_v32  ;;  %v94_v35 = vsel %vm93_vm3, %v354_v18, %v90_v30  ;;  %vm185_vm13 = vmor %vm183_vm7, %vm184_vm8 }
  0x9e   :  { %v179_v36 = vmul.f32 %v360_v29, %v178_v33  ;;  %v95_v37 = vmul.f32 1.4142135, %v94_v35  ;;  %v167_v51 = vsel %vm563_vm10, %v356_v21, %v163_v46 }
  0x9f   :  { %v106_v39 = vmul.f32 0.5, %v105_v34  ;;  %v168_v56 = vmul.f32 1.4142135, %v167_v51 }
  0xa0   :  { %v180_v40 = vmul.f32 0.5, %v179_v36  ;;  %v96_v41 = vmul.f32 %v95_v37, %v78_v0 }
  0xa1   :  { %v107_v42 = vsub.f32 1.5, %v106_v39  ;;  %v169_v60 = vmul.f32 %v168_v56, %v547_v1  ;;  %v508_v1 = vmov 0.0  }
  0xa2   :  { %v181_v44 = vsub.f32 1.5, %v180_v40  ;;  %v115_v45 = vpack.c.bf16 %v96_v41, %v96_v41  ;;  %149 = vst.msk [vmem:[#allocation5] sm:$0x1] %vm147_vm14, %v508_v1 }
  0xa3   :  { %v108_v47 = vmul.f32 %v358_v28, %v107_v42  ;;  %v170_v63 = vpack.c.bf16 %v169_v60, %v169_v60  ;;  %150 = vst.msk [vmem:[#allocation6] sm:$0x1] %vm147_vm14, %v508_v1 }
  0xa4   :  { %v182_v48 = vmul.f32 %v360_v29, %v181_v44  ;;  %117 = vst.msk [vmem:[#allocation2] sm:$0xf] %vm116_vm9, %v115_v45 }
  0xa5   :  { %v112_v49 = vsel %vm111_vm12, %v358_v28, %v108_v47 }
  0xa6   :  { %v113_v50 = vmul.f32 1.4142135, %v112_v49  ;;  %v186_v52 = vsel %vm185_vm13, %v360_v29, %v182_v48 }
  0xa7   :  { %v187_v57 = vmul.f32 1.4142135, %v186_v52 }
  0xa8   :  { %v114_v53 = vmul.f32 %v113_v50, %v551_v4 }
  0xa9   :  { %v188_v61 = vmul.f32 %v187_v57, %v553_v5  ;;  %v281_v36 = vld [vmem:[#allocation5] sm:$0x1] }
  0xaa   :  { %v118_v54 = vpack.c.bf16 %v114_v53, %v114_v53  ;;  %v120_v55 = vmul.f32 %v114_v53, %v96_v41  ;;  %v293_v45 = vld [vmem:[#allocation6] sm:$0x1] }
  0xab   :  { %v190_v58 = vld [vmem:[#allocation2] sm:$0xf]  ;;  %v189_v0 = vpack.c.bf16 %v188_v61, %v188_v61 }
  0xac   :  { %119 = vst.msk [vmem:[#allocation3] sm:$0xf] %vm116_vm9, %v118_v54  ;;  %340 = vmatpush.xpose.msk.msra.mxu0 %vm80_vm0, %v120_v55  ;;  %v196_v59 = vsel %vm80_vm0, %v190_v58, 0 }
  0xad   :  { %205 = vmatpush.bf16.xpose.msra.mxu1 %v196_v59  ;;  %221 = vmatpush.bf16.xpose.msra.mxu2 %v196_v59 }
  0xaf   :  { %341 = vmatmul.msk.f32.vlgmr.msra.gmra.mxu0 %vm80_vm0, %v507_v62 }
  0xb3   :  { %v191_v2 = vld [vmem:[#allocation3] sm:$0xf] }
  0xb4   :  { %342 = vmatmul.msk.bf16.vlgmr.msra.gmra.mxu1 %vm80_vm0, %v170_v63  ;;  %343 = vmatmul.msk.bf16.vlgmr.msra.gmra.mxu2 %vm80_vm0, %v189_v0  ;;  %v228_v3 = vsel %vm80_vm0, %v191_v2, 0 }
  0xb5   :  { %237 = vmatpush.bf16.xpose.msra.mxu3 %v228_v3  ;;  %250 = vmatpush.bf16.xpose.msrb.mxu0 %v228_v3 }
  0xbc   :  { %344 = vmatmul.msk.bf16.vlgmr.msra.gmra.mxu3 %vm80_vm0, %v170_v63  ;;  %345 = vmatmul.msk.bf16.vlgmr.msrb.gmra.mxu0 %vm80_vm0, %v189_v0  ;;  %vm282_vm0 = vcmask 64512  }
 0x12c   :  { %v144_v4 = vpop.f32.mrf.mxu0 }
 0x12d   :  { %148 = vst.msk [vmem:[#allocation4] sm:$0x1] %vm147_vm14, %v144_v4 }
 0x131   :  { %v207_v5 = vpop.f32.mrf.mxu1 }
 0x132   :  { %v269_v6 = vmul.f32 1.442695, %v207_v5 }
 0x134   :  { %361 = vpow2.f32 %v269_v6  ;;  %v306_v41 = vld [vmem:[#allocation4] sm:$0x1] }
 0x135   :  { %v307_v43 = vmul.f32 1.442695, %v306_v41 }
 0x137   :  { %v223_v7 = vpop.f32.mrf.mxu2 }
 0x138   :  { %v271_v9 = vmul.f32 1.442695, %v223_v7 }
 0x139   :  { %v209_v10 = vpop.f32.mrf.mxu1  ;;  %v252_v11 = vpop.f32.mrf.mxu0 }
 0x13a   :  { %363 = vpow2.f32 %v271_v9  ;;  %v277_v14 = vmul.f32 1.442695, %v252_v11  ;;  %v362_v15 = vpop.eup %361 }
 0x13c   :  { %365 = vpow2.f32 %v277_v14 }
 0x13f   :  { %v225_v16 = vpop.f32.mrf.mxu2  ;;  %v239_v17 = vpop.f32.mrf.mxu3 }
 0x140   :  { %v364_v18 = vpop.eup %363  ;;  %v275_v19 = vmul.f32 1.442695, %v239_v17 }
 0x141   :  { %v273_v20 = vadd.f32 %v364_v18, %v362_v15  ;;  %v254_v21 = vpop.f32.mrf.mxu0 }
 0x142   :  { %367 = vpow2.f32 %v275_v19  ;;  %v366_v25 = vpop.eup %365 }
 0x143   :  { %v274_v22 = vsel %vm266_vm15, %v273_v20, 0.0  ;;  %369 = vpow2.f32 %v307_v43 }
 0x144   :  { %v283_v23 = vsel %vm282_vm0, %v274_v22, 0.0 }
 0x145   :  { %v284_v24 = vrot.slane %v283_v23, 4 }
 0x147   :  { %v285_v26 = vadd.f32 %v284_v24, %v283_v23  ;;  %v241_v27 = vpop.f32.mrf.mxu3 }
 0x148   :  { %v368_v28 = vpop.eup %367 }
 0x149   :  { %v286_v29 = vrot.slane %v285_v26, 2  ;;  %v279_v30 = vadd.f32 %v368_v28, %v366_v25  ;;  %v370_v49 = vpop.eup %369 }
 0x14b   :  { %v287_v31 = vadd.f32 %v286_v29, %v285_v26  ;;  %v280_v32 = vsel %vm266_vm15, %v279_v30, 0.0 }
 0x14c   :  { %v294_v33 = vsel %vm282_vm0, %v280_v32, 0.0 }
 0x14d   :  { %v288_v34 = vrot.slane %v287_v31, 1  ;;  %v295_v35 = vrot.slane %v294_v33, 4 }
 0x14f   :  { %v289_v37 = vadd.f32 %v288_v34, %v287_v31  ;;  %v296_v38 = vadd.f32 %v295_v35, %v294_v33 }
 0x151   :  { %v290_v39 = vadd.f32 %v289_v37, %v281_v36  ;;  %v297_v40 = vrot.slane %v296_v38, 2 }
 0x153   :  { %292 = vst.msk [vmem:[#allocation5] sm:$0x1] %vm147_vm14, %v290_v39  ;;  %v298_v42 = vadd.f32 %v297_v40, %v296_v38 }
 0x155   :  { %v299_v44 = vrot.slane %v298_v42, 1 }
 0x157   :  { %v300_v46 = vadd.f32 %v299_v44, %v298_v42 }
 0x159   :  { %v301_v47 = vadd.f32 %v300_v46, %v293_v45 }
 0x15a   :  { %v309_v48 = vld [vmem:[#allocation5] sm:$0x1] }
 0x15b   :  { %302 = vst.msk [vmem:[#allocation6] sm:$0x1] %vm147_vm14, %v301_v47  ;;  %v310_v50 = vadd.f32 %v370_v49, %v309_v48 }
 0x15d   :  { %371 = vlog2.f32 %v310_v50 }
 0x162   :  { %v313_v51 = vld [vmem:[#allocation6] sm:$0x1] }
 0x163   :  { %v314_v52 = vadd.f32 %v370_v49, %v313_v51  ;;  %v372_v53 = vpop.eup %371 }
 0x164   :  { %v312_v55 = vmul.f32 0.6931472, %v372_v53 }
 0x165   :  { %373 = vlog2.f32 %v314_v52 }
 0x16b   :  { %v374_v54 = vpop.eup %373 }
 0x16c   :  { %v316_v56 = vmul.f32 0.6931472, %v374_v54 }
 0x16e   :  { %v317_v57 = vadd.f32 %v316_v56, %v312_v55 }
 0x170   :  { %v318_v58 = vmul.f32 0.5, %v317_v57 }
 0x172   :  { %v319_v59 = vsub.f32 %v318_v58, %v306_v41 }
 0x174   :  { %320 = vst.msk [vmem:[#allocation15] sm:$0x1] %vm147_vm14, %v319_v59 }
 0x175   :  { %331 = dma.vmem_to_hbm [thread:$0]  %s327_s3, 16, %s329_s9, [#allocation9]  }
 0x176   :  { %501 = dma.done.wait [#allocation9], 16  }
 0x177   :  { %502 = vsyncadd [#allocation9], 4294967280 }
 0x178   :  { %336 = vsyncpa [#allocation8], 1 }
 0x179   :  { %337 = vsyncpa [#allocation11], 1 }
 0x17a   :  { %338 = vsyncpa [#allocation14], 1 }
 0x17b   :  { %339 = vsyncpa [#allocation9], 1 }

</bundles_post_ra>
